<compile_context>
chip_gen: v7x
topology: tpu7x:2x2x1
jax: 0.10.0
libtpu: 0.0.40
codegen_flags: <defaults>
</compile_context>

<pallas_src>
import jax
import jax.numpy as jnp
from jax.experimental import pallas as pl
from jax.experimental.pallas import tpu as pltpu


def _round_up(x, m):
    return (x + m - 1) // m * m


def _cdiv(a, b):
    return (a + b - 1) // b


def fold_attention_params(params):
    """Once-per-model host fold of the 4 MHA projections into 2 (C,C) matrices.

    scores[n,l] = s*(q@Wq.T+bq)·(k@Wk.T+bk) equals (q@W_qk+b_qk)·k[n,l] plus a
    per-row constant (which cancels in softmax), with
        W_qk = s*Wq.T@Wk ,  b_qk = s*bq@Wk .
    Softmax weights sum to 1, so the value/output projections fold into
        out = (sum_l p_l * v_l) @ W_vo + b_vo ,  W_vo = Wv.T@Wo.T ,
        b_vo = Wo@bv + bo .
    Fold in f32; ship weights bf16 (MXU operands) and biases f32.
    """
    s = 1.0 / jnp.sqrt(jnp.float32(params["wq"].shape[0]))
    w_qk = s * (params["wq"].T @ params["wk"])
    b_qk = s * (params["bq"] @ params["wk"])
    w_vo = params["wv"].T @ params["wo"].T
    b_vo = params["bv"] @ params["wo"].T + params["bo"]
    w_all = jnp.concatenate([w_qk, w_vo], axis=1).astype(jnp.bfloat16)   # (C, 2C)
    b_all = jnp.stack([b_qk, b_vo], axis=0).astype(jnp.float32)          # (2, C)
    return w_all, b_all


def _temporal_attn_kernel(q_ref, qpe_ref, k_ref, kpe_ref, w_ref, b_ref,
                          qpos_out_ref, attn_out_ref):
    """One tile of TN query voxels.

    q_ref/qpe_ref : (TN, C)   f32
    k_ref/kpe_ref : (TN, L*C) bf16  flattened kNN sequences; per-l slice is a
                                    lane-aligned 128-column block (no relayout)
    w_ref         : (C, 2C)   bf16  [W_qk | W_vo]
    b_ref         : (2, C)    f32   rows = [b_qk, b_vo]
    """
    c = q_ref.shape[-1]
    l = k_ref.shape[-1] // c

    # ---- with_pos(pts_query_feats.unsqueeze(1), pts_query_pe) -------------
    q = q_ref[...] + qpe_ref[...]                                # (TN, C) f32
    qpos_out_ref[...] = q.astype(qpos_out_ref.dtype)

    w_qk = w_ref[:, :c]
    w_vo = w_ref[:, c:]
    b_qk = b_ref[0:1, :]
    b_vo = b_ref[1:2, :]

    # ---- folded query projection (1/sqrt(C), Wq and Wk already folded) ----
    qt = jnp.dot(q.astype(jnp.bfloat16), w_qk,
                 preferred_element_type=jnp.float32) + b_qk      # (TN, C) f32

    # ---- packed scores over the L temporal neighbours ---------------------
    s_cols = []
    for li in range(l):
        col = slice(li * c, (li + 1) * c)
        k3 = k_ref[:, col] + kpe_ref[:, col]                     # bf16 (TN, C)
        s_cols.append(jnp.sum(qt * k3, axis=-1, keepdims=True))  # f32  (TN, 1)
    s = jnp.concatenate(s_cols, axis=-1)                         # (TN, L) f32

    m = jnp.max(s, axis=-1, keepdims=True)
    p = jnp.exp(s - m)
    p = p * pl.reciprocal(jnp.sum(p, axis=-1, keepdims=True), approx=True)

    # ---- context on RAW bf16 values; Wv/Wo merged into one (C,C) matmul ---
    ctx = p[:, 0:1] * k_ref[:, 0:c]                              # f32 (TN, C)
    for li in range(1, l):
        col = slice(li * c, (li + 1) * c)
        ctx = ctx + p[:, li:li + 1] * k_ref[:, col]

    out = jnp.dot(ctx.astype(jnp.bfloat16), w_vo,
                  preferred_element_type=jnp.float32) + b_vo
    attn_out_ref[...] = out.astype(attn_out_ref.dtype)


def temporal_attn_forward(pts_query_feats, pts_query_pe, knn_feat_seq,
                          knn_pe_seq, params=None, *, folded_params=None,
                          tn=512, vmem_limit_bytes=None):
    """Returns (pts_query_feats_with_pe (N,1,C) f32, attn_out (N,1,C) bf16).

    tn: row tile (default 512; rounded to a multiple of 16, clamped to N, and
        capped so the grid keeps >= 2 steps when N allows, for v7x megacore).
        No host-side padding: the last grid block is ragged and its tail
        writes are masked by the Pallas pipeline.
    folded_params: optional (w_all, b_all) from fold_attention_params(); pass
        it to keep the host-side weight fold out of the per-call path.
    """
    N, C = pts_query_feats.shape
    L = knn_feat_seq.shape[1]

    if folded_params is None:
        folded_params = fold_attention_params(params)
    w_all, b_all = folded_params

    # ---- row-tile choice ---------------------------------------------------
    tile = min(tn, _round_up(N, 16))
    if N > 32:                      # keep >= 2 grid steps for 2-TC sharding
        tile = min(tile, _round_up(_cdiv(N, 2), 16))
    tile = max(16, _round_up(tile, 16))
    grid = (_cdiv(N, tile),)

    q = pts_query_feats.astype(jnp.float32)
    qpe = pts_query_pe.reshape(N, C).astype(jnp.float32)
    # (N, L, C) -> (N, L*C) is a row-major bitcast (no HBM pass); stream bf16.
    kseq = knn_feat_seq.reshape(N, L * C).astype(jnp.bfloat16)
    kpe = knn_pe_seq.reshape(N, L * C).astype(jnp.bfloat16)

    row_spec = pl.BlockSpec((tile, C), lambda i: (i, 0))
    seq_spec = pl.BlockSpec((tile, L * C), lambda i: (i, 0))
    w_spec = pl.BlockSpec((C, 2 * C), lambda i: (0, 0))
    b_spec = pl.BlockSpec((2, C), lambda i: (0, 0))

    q_pos, attn_out = pl.pallas_call(
        _temporal_attn_kernel,
        out_shape=(jax.ShapeDtypeStruct((N, C), jnp.float32),
                   jax.ShapeDtypeStruct((N, C), jnp.bfloat16)),
        grid=grid,
        in_specs=[row_spec, row_spec, seq_spec, seq_spec, w_spec, b_spec],
        out_specs=[row_spec, row_spec],
        compiler_params=pltpu.CompilerParams(
            dimension_semantics=("parallel",),
            vmem_limit_bytes=vmem_limit_bytes),
    )(q, qpe, kseq, kpe, w_all, b_all)

    return q_pos.reshape(N, 1, C), attn_out.reshape(N, 1, C)


def _reference(pts_query_feats, pts_query_pe, knn_feat_seq, knn_pe_seq, params):
    """Pure-JAX f32 reference of the same math (eval-mode MHA, 1 head)."""
    N, C = pts_query_feats.shape
    q = pts_query_feats + pts_query_pe.reshape(N, C)
    k = knn_feat_seq + knn_pe_seq
    v = knn_feat_seq
    qp = q @ params["wq"].T + params["bq"]
    kp = jnp.einsum("nlc,dc->nld", k, params["wk"]) + params["bk"]
    vp = jnp.einsum("nlc,dc->nld", v, params["wv"]) + params["bv"]
    scores = jnp.einsum("nd,nld->nl", qp, kp) / jnp.sqrt(jnp.float32(C))
    attn = jax.nn.softmax(scores, axis=-1)
    ctx = jnp.einsum("nl,nld->nd", attn, vp)
    out = ctx @ params["wo"].T + params["bo"]
    return q.reshape(N, 1, C), out.reshape(N, 1, C)


def make_params(key, pts_channels):
    """Deterministic init mirroring nn.MultiheadAttention parameter shapes."""
    C = pts_channels
    k1, k2, k3 = jax.random.split(key, 3)
    in_proj_weight = 0.02 * jax.random.normal(k1, (3 * C, C), jnp.float32)
    in_proj_bias = 0.01 * jax.random.normal(k2, (3 * C,), jnp.float32)
    out_proj_weight = 0.02 * jax.random.normal(k3, (C, C), jnp.float32)
    out_proj_bias = jnp.zeros((C,), jnp.float32)
    wq, wk, wv = jnp.split(in_proj_weight, 3, axis=0)
    bq, bk, bv = jnp.split(in_proj_bias, 3, axis=0)
    return dict(wq=wq, wk=wk, wv=wv, bq=bq, bk=bk, bv=bv,
                wo=out_proj_weight, bo=out_proj_bias)


def _check(pts_query_feats, pts_query_pe, knn_feat_seq, knn_pe_seq, params,
           folded, **kw):
    q_pos, attn_out = temporal_attn_forward(
        pts_query_feats, pts_query_pe, knn_feat_seq, knn_pe_seq,
        folded_params=folded, **kw)
    jax.block_until_ready((q_pos, attn_out))
    q_pos_ref, attn_ref = _reference(
        pts_query_feats, pts_query_pe, knn_feat_seq, knn_pe_seq, params)
    # with_pos is exact f32; the attention path uses bf16 streams, bf16 MXU
    # operands, host-folded bf16 weights and an approx reciprocal -> loosened
    # tolerance vs the f32 reference.
    assert jnp.allclose(q_pos, q_pos_ref, atol=1e-5, rtol=1e-5)
    assert jnp.allclose(attn_out.astype(jnp.float32), attn_ref,
                        atol=1e-2, rtol=1e-2)


if __name__ == "__main__":
    # Small shapes consistent with the module: pts_channels=128, temporal kNN
    # sequence length 8, batch_size=2 (API only).
    key = jax.random.PRNGKey(0)
    k_feat, k_pe, k_knn, k_knnpe, k_par = jax.random.split(key, 5)

    batch_size = 2
    C, L = 128, 8
    params = make_params(k_par, C)
    folded = fold_attention_params(params)          # hoisted: once per model

    # Case 1: 16 query voxels, default tile (clamped automatically).
    N = 16
    pts_query_feats = jax.random.normal(k_feat, (N, C), jnp.float32)
    pts_query_indices = jnp.zeros((N, 4), jnp.int32)          # (batch, z, y, x) - unused
    pts_query_pe = jax.random.normal(k_pe, (N, 1, C), jnp.float32)
    knn_feat_seq = jax.random.normal(k_knn, (N, L, C), jnp.float32)
    knn_pe_seq = jax.random.normal(k_knnpe, (N, L, C), jnp.float32)
    knn_indices_seq = jnp.zeros((N, L), jnp.int32)            # unused (see TODO above)
    _check(pts_query_feats, pts_query_pe, knn_feat_seq, knn_pe_seq, params, folded)

    # Case 2: non-tile-multiple voxel count + multi-step ragged grid.
    N2 = 200
    f2 = jax.random.normal(k_feat, (N2, C), jnp.float32)
    pe2 = jax.random.normal(k_pe, (N2, 1, C), jnp.float32)
    kf2 = jax.random.normal(k_knn, (N2, L, C), jnp.float32)
    kp2 = jax.random.normal(k_knnpe, (N2, L, C), jnp.float32)
    _check(f2, pe2, kf2, kp2, params, folded, tn=64)

    print("KERNEL_OK")
</pallas_src>

<mosaic_0001>
module attributes {stable_mosaic.version = 11 : i64} {
  func.func @_temporal_attn_kernel(%arg0: i32, %arg1: memref<16x128xf32, #tpu.memory_space<vmem>>, %arg2: memref<16x128xf32, #tpu.memory_space<vmem>>, %arg3: memref<16x1024xbf16, #tpu.memory_space<vmem>>, %arg4: memref<16x1024xbf16, #tpu.memory_space<vmem>>, %arg5: memref<128x256xbf16, #tpu.memory_space<vmem>>, %arg6: memref<2x128xf32, #tpu.memory_space<vmem>>, %arg7: memref<16x128xf32, #tpu.memory_space<vmem>>, %arg8: memref<16x128xbf16, #tpu.memory_space<vmem>>) attributes {dimension_semantics = [#tpu.dimension_semantics<parallel>], iteration_bounds = array<i64: 1>, scalar_prefetch = 0 : i64, scratch_operands = 0 : i64, tpu.core_type = #tpu.core_type<tc>, window_params = [{transform_indices = @transform_0, window_bounds = array<i64: 16, 128>}, {transform_indices = @transform_1, window_bounds = array<i64: 16, 128>}, {transform_indices = @transform_2, window_bounds = array<i64: 16, 1024>}, {transform_indices = @transform_3, window_bounds = array<i64: 16, 1024>}, {pipeline_mode = #tpu.pipeline_mode<synchronous>, transform_indices = @transform_4, window_bounds = array<i64: 128, 256>}, {pipeline_mode = #tpu.pipeline_mode<synchronous>, transform_indices = @transform_5, window_bounds = array<i64: 2, 128>}, {transform_indices = @transform_6, window_bounds = array<i64: 16, 128>}, {transform_indices = @transform_7, window_bounds = array<i64: 16, 128>}]} {
    %c0 = arith.constant 0 : index
    %c0_0 = arith.constant 0 : index
    %0 = vector.load %arg1[%c0, %c0_0] : memref<16x128xf32, #tpu.memory_space<vmem>>, vector<16x128xf32>
    %c0_1 = arith.constant 0 : index
    %c0_2 = arith.constant 0 : index
    %1 = vector.load %arg2[%c0_1, %c0_2] : memref<16x128xf32, #tpu.memory_space<vmem>>, vector<16x128xf32>
    %2 = arith.addf %0, %1 : vector<16x128xf32>
    %c0_3 = arith.constant 0 : index
    %c0_4 = arith.constant 0 : index
    %3 = vector.load %arg7[%c0_3, %c0_4] : memref<16x128xf32, #tpu.memory_space<vmem>>, vector<16x128xf32>
    tpu.vector_store %arg7[%c0_3, %c0_4], %2 {strides = array<i32>} : memref<16x128xf32, #tpu.memory_space<vmem>>, vector<16x128xf32>,
    %c0_5 = arith.constant 0 : index
    %c0_6 = arith.constant 0 : index
    %4 = vector.load %arg5[%c0_5, %c0_6] : memref<128x256xbf16, #tpu.memory_space<vmem>>, vector<128x128xbf16>
    %c0_7 = arith.constant 0 : index
    %c128 = arith.constant 128 : index
    %5 = vector.load %arg5[%c0_7, %c128] : memref<128x256xbf16, #tpu.memory_space<vmem>>, vector<128x128xbf16>
    %c0_8 = arith.constant 0 : index
    %c0_9 = arith.constant 0 : index
    %6 = vector.load %arg6[%c0_8, %c0_9] : memref<2x128xf32, #tpu.memory_space<vmem>>, vector<1x128xf32>
    %c1 = arith.constant 1 : index
    %c0_10 = arith.constant 0 : index
    %7 = vector.load %arg6[%c1, %c0_10] : memref<2x128xf32, #tpu.memory_space<vmem>>, vector<1x128xf32>
    %8 = arith.truncf %2 : vector<16x128xf32> to vector<16x128xbf16>
    %cst = arith.constant dense<0.000000e+00> : vector<16x128xf32>
    %9 = tpu.matmul %8, %4, %cst {dimension_numbers = #tpu.dot_dimension_numbers<[1], [0], [0], [1], [0, 0, 1, 1], [], []>} : vector<16x128xbf16>, vector<128x128xbf16>, vector<16x128xf32> -> vector<16x128xf32>
    %10 = vector.broadcast %6 : vector<1x128xf32> to vector<16x128xf32>
    %11 = arith.addf %9, %10 : vector<16x128xf32>
    %c0_11 = arith.constant 0 : index
    %c0_12 = arith.constant 0 : index
    %12 = vector.load %arg3[%c0_11, %c0_12] : memref<16x1024xbf16, #tpu.memory_space<vmem>>, vector<16x128xbf16>
    %c0_13 = arith.constant 0 : index
    %c0_14 = arith.constant 0 : index
    %13 = vector.load %arg4[%c0_13, %c0_14] : memref<16x1024xbf16, #tpu.memory_space<vmem>>, vector<16x128xbf16>
    %14 = arith.addf %12, %13 : vector<16x128xbf16>
    %15 = arith.extf %14 : vector<16x128xbf16> to vector<16x128xf32>
    %16 = arith.mulf %11, %15 : vector<16x128xf32>
    %cst_15 = arith.constant dense<0.000000e+00> : vector<16xf32>
    %17 = vector.multi_reduction <add>, %16, %cst_15 [1] : vector<16x128xf32> to vector<16xf32>
    %18 = vector.shape_cast %17 : vector<16xf32> to vector<16x1xf32>
    %c0_16 = arith.constant 0 : index
    %c128_17 = arith.constant 128 : index
    %19 = vector.load %arg3[%c0_16, %c128_17] : memref<16x1024xbf16, #tpu.memory_space<vmem>>, vector<16x128xbf16>
    %c0_18 = arith.constant 0 : index
    %c128_19 = arith.constant 128 : index
    %20 = vector.load %arg4[%c0_18, %c128_19] : memref<16x1024xbf16, #tpu.memory_space<vmem>>, vector<16x128xbf16>
    %21 = arith.addf %19, %20 : vector<16x128xbf16>
    %22 = arith.extf %21 : vector<16x128xbf16> to vector<16x128xf32>
    %23 = arith.mulf %11, %22 : vector<16x128xf32>
    %cst_20 = arith.constant dense<0.000000e+00> : vector<16xf32>
    %24 = vector.multi_reduction <add>, %23, %cst_20 [1] : vector<16x128xf32> to vector<16xf32>
    %25 = vector.shape_cast %24 : vector<16xf32> to vector<16x1xf32>
    %c0_21 = arith.constant 0 : index
    %c256 = arith.constant 256 : index
    %26 = vector.load %arg3[%c0_21, %c256] : memref<16x1024xbf16, #tpu.memory_space<vmem>>, vector<16x128xbf16>
    %c0_22 = arith.constant 0 : index
    %c256_23 = arith.constant 256 : index
    %27 = vector.load %arg4[%c0_22, %c256_23] : memref<16x1024xbf16, #tpu.memory_space<vmem>>, vector<16x128xbf16>
    %28 = arith.addf %26, %27 : vector<16x128xbf16>
    %29 = arith.extf %28 : vector<16x128xbf16> to vector<16x128xf32>
    %30 = arith.mulf %11, %29 : vector<16x128xf32>
    %cst_24 = arith.constant dense<0.000000e+00> : vector<16xf32>
    %31 = vector.multi_reduction <add>, %30, %cst_24 [1] : vector<16x128xf32> to vector<16xf32>
    %32 = vector.shape_cast %31 : vector<16xf32> to vector<16x1xf32>
    %c0_25 = arith.constant 0 : index
    %c384 = arith.constant 384 : index
    %33 = vector.load %arg3[%c0_25, %c384] : memref<16x1024xbf16, #tpu.memory_space<vmem>>, vector<16x128xbf16>
    %c0_26 = arith.constant 0 : index
    %c384_27 = arith.constant 384 : index
    %34 = vector.load %arg4[%c0_26, %c384_27] : memref<16x1024xbf16, #tpu.memory_space<vmem>>, vector<16x128xbf16>
    %35 = arith.addf %33, %34 : vector<16x128xbf16>
    %36 = arith.extf %35 : vector<16x128xbf16> to vector<16x128xf32>
    %37 = arith.mulf %11, %36 : vector<16x128xf32>
    %cst_28 = arith.constant dense<0.000000e+00> : vector<16xf32>
    %38 = vector.multi_reduction <add>, %37, %cst_28 [1] : vector<16x128xf32> to vector<16xf32>
    %39 = vector.shape_cast %38 : vector<16xf32> to vector<16x1xf32>
    %c0_29 = arith.constant 0 : index
    %c512 = arith.constant 512 : index
    %40 = vector.load %arg3[%c0_29, %c512] : memref<16x1024xbf16, #tpu.memory_space<vmem>>, vector<16x128xbf16>
    %c0_30 = arith.constant 0 : index
    %c512_31 = arith.constant 512 : index
    %41 = vector.load %arg4[%c0_30, %c512_31] : memref<16x1024xbf16, #tpu.memory_space<vmem>>, vector<16x128xbf16>
    %42 = arith.addf %40, %41 : vector<16x128xbf16>
    %43 = arith.extf %42 : vector<16x128xbf16> to vector<16x128xf32>
    %44 = arith.mulf %11, %43 : vector<16x128xf32>
    %cst_32 = arith.constant dense<0.000000e+00> : vector<16xf32>
    %45 = vector.multi_reduction <add>, %44, %cst_32 [1] : vector<16x128xf32> to vector<16xf32>
    %46 = vector.shape_cast %45 : vector<16xf32> to vector<16x1xf32>
    %c0_33 = arith.constant 0 : index
    %c640 = arith.constant 640 : index
    %47 = vector.load %arg3[%c0_33, %c640] : memref<16x1024xbf16, #tpu.memory_space<vmem>>, vector<16x128xbf16>
    %c0_34 = arith.constant 0 : index
    %c640_35 = arith.constant 640 : index
    %48 = vector.load %arg4[%c0_34, %c640_35] : memref<16x1024xbf16, #tpu.memory_space<vmem>>, vector<16x128xbf16>
    %49 = arith.addf %47, %48 : vector<16x128xbf16>
    %50 = arith.extf %49 : vector<16x128xbf16> to vector<16x128xf32>
    %51 = arith.mulf %11, %50 : vector<16x128xf32>
    %cst_36 = arith.constant dense<0.000000e+00> : vector<16xf32>
    %52 = vector.multi_reduction <add>, %51, %cst_36 [1] : vector<16x128xf32> to vector<16xf32>
    %53 = vector.shape_cast %52 : vector<16xf32> to vector<16x1xf32>
    %c0_37 = arith.constant 0 : index
    %c768 = arith.constant 768 : index
    %54 = vector.load %arg3[%c0_37, %c768] : memref<16x1024xbf16, #tpu.memory_space<vmem>>, vector<16x128xbf16>
    %c0_38 = arith.constant 0 : index
    %c768_39 = arith.constant 768 : index
    %55 = vector.load %arg4[%c0_38, %c768_39] : memref<16x1024xbf16, #tpu.memory_space<vmem>>, vector<16x128xbf16>
    %56 = arith.addf %54, %55 : vector<16x128xbf16>
    %57 = arith.extf %56 : vector<16x128xbf16> to vector<16x128xf32>
    %58 = arith.mulf %11, %57 : vector<16x128xf32>
    %cst_40 = arith.constant dense<0.000000e+00> : vector<16xf32>
    %59 = vector.multi_reduction <add>, %58, %cst_40 [1] : vector<16x128xf32> to vector<16xf32>
    %60 = vector.shape_cast %59 : vector<16xf32> to vector<16x1xf32>
    %c0_41 = arith.constant 0 : index
    %c896 = arith.constant 896 : index
    %61 = vector.load %arg3[%c0_41, %c896] : memref<16x1024xbf16, #tpu.memory_space<vmem>>, vector<16x128xbf16>
    %c0_42 = arith.constant 0 : index
    %c896_43 = arith.constant 896 : index
    %62 = vector.load %arg4[%c0_42, %c896_43] : memref<16x1024xbf16, #tpu.memory_space<vmem>>, vector<16x128xbf16>
    %63 = arith.addf %61, %62 : vector<16x128xbf16>
    %64 = arith.extf %63 : vector<16x128xbf16> to vector<16x128xf32>
    %65 = arith.mulf %11, %64 : vector<16x128xf32>
    %cst_44 = arith.constant dense<0.000000e+00> : vector<16xf32>
    %66 = vector.multi_reduction <add>, %65, %cst_44 [1] : vector<16x128xf32> to vector<16xf32>
    %67 = vector.shape_cast %66 : vector<16xf32> to vector<16x1xf32>
    %68 = tpu.concatenate %18, %25, %32, %39, %46, %53, %60, %67 in 1 : vector<16x1xf32>, vector<16x1xf32>, vector<16x1xf32>, vector<16x1xf32>, vector<16x1xf32>, vector<16x1xf32>, vector<16x1xf32>, vector<16x1xf32> -> vector<16x8xf32>
    %cst_45 = arith.constant dense<0xFF800000> : vector<16xf32>
    %69 = vector.multi_reduction <maximumf>, %68, %cst_45 [1] : vector<16x8xf32> to vector<16xf32>
    %70 = vector.shape_cast %69 : vector<16xf32> to vector<16x1xf32>
    %71 = vector.broadcast %70 : vector<16x1xf32> to vector<16x8xf32>
    %72 = arith.subf %68, %71 : vector<16x8xf32>
    %73 = math.exp %72 : vector<16x8xf32>
    %cst_46 = arith.constant dense<0.000000e+00> : vector<16xf32>
    %74 = vector.multi_reduction <add>, %73, %cst_46 [1] : vector<16x8xf32> to vector<16xf32>
    %75 = vector.shape_cast %74 : vector<16xf32> to vector<16x1xf32>
    %76 = tpu.reciprocal %75 {approx = true} : vector<16x1xf32> -> vector<16x1xf32>
    %77 = vector.broadcast %76 : vector<16x1xf32> to vector<16x8xf32>
    %78 = arith.mulf %73, %77 : vector<16x8xf32>
    %79 = vector.extract_strided_slice %78 {offsets = [0, 0], sizes = [16, 1], strides = [1, 1]} : vector<16x8xf32> to vector<16x1xf32>
    %c0_47 = arith.constant 0 : index
    %c0_48 = arith.constant 0 : index
    %80 = vector.load %arg3[%c0_47, %c0_48] : memref<16x1024xbf16, #tpu.memory_space<vmem>>, vector<16x128xbf16>
    %81 = arith.extf %80 : vector<16x128xbf16> to vector<16x128xf32>
    %82 = vector.broadcast %79 : vector<16x1xf32> to vector<16x128xf32>
    %83 = arith.mulf %82, %81 : vector<16x128xf32>
    %84 = vector.extract_strided_slice %78 {offsets = [0, 1], sizes = [16, 1], strides = [1, 1]} : vector<16x8xf32> to vector<16x1xf32>
    %c0_49 = arith.constant 0 : index
    %c128_50 = arith.constant 128 : index
    %85 = vector.load %arg3[%c0_49, %c128_50] : memref<16x1024xbf16, #tpu.memory_space<vmem>>, vector<16x128xbf16>
    %86 = arith.extf %85 : vector<16x128xbf16> to vector<16x128xf32>
    %87 = vector.broadcast %84 : vector<16x1xf32> to vector<16x128xf32>
    %88 = arith.mulf %87, %86 : vector<16x128xf32>
    %89 = arith.addf %83, %88 : vector<16x128xf32>
    %90 = vector.extract_strided_slice %78 {offsets = [0, 2], sizes = [16, 1], strides = [1, 1]} : vector<16x8xf32> to vector<16x1xf32>
    %c0_51 = arith.constant 0 : index
    %c256_52 = arith.constant 256 : index
    %91 = vector.load %arg3[%c0_51, %c256_52] : memref<16x1024xbf16, #tpu.memory_space<vmem>>, vector<16x128xbf16>
    %92 = arith.extf %91 : vector<16x128xbf16> to vector<16x128xf32>
    %93 = vector.broadcast %90 : vector<16x1xf32> to vector<16x128xf32>
    %94 = arith.mulf %93, %92 : vector<16x128xf32>
    %95 = arith.addf %89, %94 : vector<16x128xf32>
    %96 = vector.extract_strided_slice %78 {offsets = [0, 3], sizes = [16, 1], strides = [1, 1]} : vector<16x8xf32> to vector<16x1xf32>
    %c0_53 = arith.constant 0 : index
    %c384_54 = arith.constant 384 : index
    %97 = vector.load %arg3[%c0_53, %c384_54] : memref<16x1024xbf16, #tpu.memory_space<vmem>>, vector<16x128xbf16>
    %98 = arith.extf %97 : vector<16x128xbf16> to vector<16x128xf32>
    %99 = vector.broadcast %96 : vector<16x1xf32> to vector<16x128xf32>
    %100 = arith.mulf %99, %98 : vector<16x128xf32>
    %101 = arith.addf %95, %100 : vector<16x128xf32>
    %102 = vector.extract_strided_slice %78 {offsets = [0, 4], sizes = [16, 1], strides = [1, 1]} : vector<16x8xf32> to vector<16x1xf32>
    %c0_55 = arith.constant 0 : index
    %c512_56 = arith.constant 512 : index
    %103 = vector.load %arg3[%c0_55, %c512_56] : memref<16x1024xbf16, #tpu.memory_space<vmem>>, vector<16x128xbf16>
    %104 = arith.extf %103 : vector<16x128xbf16> to vector<16x128xf32>
    %105 = vector.broadcast %102 : vector<16x1xf32> to vector<16x128xf32>
    %106 = arith.mulf %105, %104 : vector<16x128xf32>
    %107 = arith.addf %101, %106 : vector<16x128xf32>
    %108 = vector.extract_strided_slice %78 {offsets = [0, 5], sizes = [16, 1], strides = [1, 1]} : vector<16x8xf32> to vector<16x1xf32>
    %c0_57 = arith.constant 0 : index
    %c640_58 = arith.constant 640 : index
    %109 = vector.load %arg3[%c0_57, %c640_58] : memref<16x1024xbf16, #tpu.memory_space<vmem>>, vector<16x128xbf16>
    %110 = arith.extf %109 : vector<16x128xbf16> to vector<16x128xf32>
    %111 = vector.broadcast %108 : vector<16x1xf32> to vector<16x128xf32>
    %112 = arith.mulf %111, %110 : vector<16x128xf32>
    %113 = arith.addf %107, %112 : vector<16x128xf32>
    %114 = vector.extract_strided_slice %78 {offsets = [0, 6], sizes = [16, 1], strides = [1, 1]} : vector<16x8xf32> to vector<16x1xf32>
    %c0_59 = arith.constant 0 : index
    %c768_60 = arith.constant 768 : index
    %115 = vector.load %arg3[%c0_59, %c768_60] : memref<16x1024xbf16, #tpu.memory_space<vmem>>, vector<16x128xbf16>
    %116 = arith.extf %115 : vector<16x128xbf16> to vector<16x128xf32>
    %117 = vector.broadcast %114 : vector<16x1xf32> to vector<16x128xf32>
    %118 = arith.mulf %117, %116 : vector<16x128xf32>
    %119 = arith.addf %113, %118 : vector<16x128xf32>
    %120 = vector.extract_strided_slice %78 {offsets = [0, 7], sizes = [16, 1], strides = [1, 1]} : vector<16x8xf32> to vector<16x1xf32>
    %c0_61 = arith.constant 0 : index
    %c896_62 = arith.constant 896 : index
    %121 = vector.load %arg3[%c0_61, %c896_62] : memref<16x1024xbf16, #tpu.memory_space<vmem>>, vector<16x128xbf16>
    %122 = arith.extf %121 : vector<16x128xbf16> to vector<16x128xf32>
    %123 = vector.broadcast %120 : vector<16x1xf32> to vector<16x128xf32>
    %124 = arith.mulf %123, %122 : vector<16x128xf32>
    %125 = arith.addf %119, %124 : vector<16x128xf32>
    %126 = arith.truncf %125 : vector<16x128xf32> to vector<16x128xbf16>
    %cst_63 = arith.constant dense<0.000000e+00> : vector<16x128xf32>
    %127 = tpu.matmul %126, %5, %cst_63 {dimension_numbers = #tpu.dot_dimension_numbers<[1], [0], [0], [1], [0, 0, 1, 1], [], []>} : vector<16x128xbf16>, vector<128x128xbf16>, vector<16x128xf32> -> vector<16x128xf32>
    %128 = vector.broadcast %7 : vector<1x128xf32> to vector<16x128xf32>
    %129 = arith.addf %127, %128 : vector<16x128xf32>
    %130 = arith.truncf %129 : vector<16x128xf32> to vector<16x128xbf16>
    %c0_64 = arith.constant 0 : index
    %c0_65 = arith.constant 0 : index
    %131 = vector.load %arg8[%c0_64, %c0_65] : memref<16x128xbf16, #tpu.memory_space<vmem>>, vector<16x128xbf16>
    tpu.vector_store %arg8[%c0_64, %c0_65], %130 {strides = array<i32>} : memref<16x128xbf16, #tpu.memory_space<vmem>>, vector<16x128xbf16>,
    return
  }
  func.func @transform_0(%arg0: i32) -> (i32, i32) {
    %c0_i32 = arith.constant 0 : i32
    %c0_i32_0 = arith.constant 0 : i32
    return %arg0, %c0_i32 : i32, i32
  }
  func.func @transform_1(%arg0: i32) -> (i32, i32) {
    %c0_i32 = arith.constant 0 : i32
    %c0_i32_0 = arith.constant 0 : i32
    return %arg0, %c0_i32 : i32, i32
  }
  func.func @transform_2(%arg0: i32) -> (i32, i32) {
    %c0_i32 = arith.constant 0 : i32
    %c0_i32_0 = arith.constant 0 : i32
    return %arg0, %c0_i32 : i32, i32
  }
  func.func @transform_3(%arg0: i32) -> (i32, i32) {
    %c0_i32 = arith.constant 0 : i32
    %c0_i32_0 = arith.constant 0 : i32
    return %arg0, %c0_i32 : i32, i32
  }
  func.func @transform_4(%arg0: i32) -> (i32, i32) {
    %c0_i32 = arith.constant 0 : i32
    %c0_i32_0 = arith.constant 0 : i32
    %c0_i32_1 = arith.constant 0 : i32
    return %c0_i32, %c0_i32_0 : i32, i32
  }
  func.func @transform_5(%arg0: i32) -> (i32, i32) {
    %c0_i32 = arith.constant 0 : i32
    %c0_i32_0 = arith.constant 0 : i32
    %c0_i32_1 = arith.constant 0 : i32
    return %c0_i32, %c0_i32_0 : i32, i32
  }
  func.func @transform_6(%arg0: i32) -> (i32, i32) {
    %c0_i32 = arith.constant 0 : i32
    %c0_i32_0 = arith.constant 0 : i32
    return %arg0, %c0_i32 : i32, i32
  }
  func.func @transform_7(%arg0: i32) -> (i32, i32) {
    %c0_i32 = arith.constant 0 : i32
    %c0_i32_0 = arith.constant 0 : i32
    return %arg0, %c0_i32 : i32, i32
  }
}

</mosaic_0001>

<bundles_post_ra>
// kernel: tpu_custom_call.1
= control target key start
LH: loop header
LB: loop body
LE: loop exit
PB: predicated region body
PF: predicated region fallthrough
CT: control target
= control target key end

     0   :  { %13 = vsyncpa [#allocation3], 0  ;;  %s1228_s0 = inlined_call_operand.hbm [shape: f32[16,128], index: 0, kind: input, shape index: {}]   ;;  %s1229_s1 = inlined_call_operand.hbm [shape: f32[16,128], index: 1, kind: input, shape index: {}]   ;;  %s1230_s2 = inlined_call_operand.hbm [shape: bf16[16,1024], index: 2, kind: input, shape index: {}]   ;;  %s1231_s3 = inlined_call_operand.hbm [shape: bf16[16,1024], index: 3, kind: input, shape index: {}]   ;;  %s1232_s4 = inlined_call_operand.hbm [shape: bf16[128,256], index: 4, kind: input, shape index: {}]   ;;  %s1233_s5 = inlined_call_operand.vmem [shape: f32[2,128], index: 5, kind: input, shape index: {}]   ;;  %s1234_s6 = inlined_call_operand.hbm [shape: f32[16,128], index: 6, kind: output, shape index: {0}]   ;;  %s1235_s7 = inlined_call_operand.hbm [shape: bf16[16,128], index: 7, kind: output, shape index: {1}]  }
   0x1   :  { %14 = vsyncpa [#allocation6], 0 }
   0x2   :  { %15 = vsyncpa [#allocation9], 0 }
   0x3   :  { %16 = vsyncpa [#allocation4], 0 }
   0x4   :  { %17 = vsyncpa [#allocation13], 0  ;;  %s951_s24 = smov [#allocation5]   ;;  %s787_s28 = scalar_lea.hbm %s1229_s1, 256 }
   0x5   :  { %s35_s25 = sshll.u32 %s951_s24, 4  ;;  %p788_p0 = scmp.ne.s32.totalorder %s1229_s1, %s787_s28  ;;  %s36_s25 = int_to_ptr.vmem [resolvable:$true] %s35_s25 }
   0x6   :  { %p791_p1 = scmp.lt.u32.totalorder %s787_s28, %s1229_s1 }
   0x8   :  { %p793_p2 = pnand %p791_p1, %p788_p0 }
   0xa   :  { %796 = shalt.err (!%p793_p2)
}
   0xb   :  { %s797_s10 = scalar_lea.vmem %s36_s25, 256  ;;  %p802_p4 = scmp.lt.s32.totalorder %s36_s25, %s36_s25 }
   0xc   :  { %p798_p3 = scmp.ne.s32.totalorder %s36_s25, %s797_s10  ;;  %p803_p5 = scmp.lt.s32.totalorder %s797_s10, %s797_s10 }
   0xe   :  { %p804_p6 = por %p803_p5, %p802_p4 }
  0x10   :  { %p805_p7 = pnand %p804_p6, %p798_p3 }
  0x12   :  { %808 = shalt.err (!%p805_p7)
}
  0x13   :  { %s952_s11 = smov 128   ;;  %s953_s12 = smov 8  }
  0x14   :  { %41 = dma.hbm_to_vmem [thread:$0]  %s1229_s1, 256, %s36_s25, [#allocation6], %s952_s11, %s952_s11, %s953_s12  }
  0x15   :  { %s954_s15 = smov [#allocation8]   ;;  %s955_s17 = smov [#allocation2]  }
  0x16   :  { %s59_s16 = sshll.u32 %s954_s15, 4  ;;  %s23_s18 = sshll.u32 %s955_s17, 4  ;;  %s60_s16 = int_to_ptr.vmem [resolvable:$true] %s59_s16  ;;  %s24_s18 = int_to_ptr.vmem [resolvable:$true] %s23_s18 }
  0x17   :  { %s809_s21 = scalar_lea.hbm %s1231_s3, 1024 }
  0x18   :  { %p810_p8 = scmp.ne.s32.totalorder %s1231_s3, %s809_s21  ;;  %p813_p9 = scmp.lt.u32.totalorder %s809_s21, %s1231_s3 }
  0x1a   :  { %p815_p10 = pnand %p813_p9, %p810_p8 }
  0x1c   :  { %818 = shalt.err (!%p815_p10)
}
  0x1d   :  { %s819_s1 = scalar_lea.vmem %s60_s16, 1024  ;;  %p824_p12 = scmp.lt.s32.totalorder %s60_s16, %s60_s16 }
  0x1e   :  { %p820_p11 = scmp.ne.s32.totalorder %s60_s16, %s819_s1  ;;  %p825_p13 = scmp.lt.s32.totalorder %s819_s1, %s819_s1 }
  0x20   :  { %p826_p0 = por %p825_p13, %p824_p12 }
  0x22   :  { %p827_p1 = pnand %p826_p0, %p820_p11 }
  0x24   :  { %830 = shalt.err (!%p827_p1)
}
  0x25   :  { %s956_s25 = smov 512   ;;  %s957_s27 = smov 32  }
  0x26   :  { %65 = dma.hbm_to_vmem [thread:$0]  %s1231_s3, 1024, %s60_s16, [#allocation9], %s956_s25, %s956_s25, %s957_s27  }
  0x27   :  { %s831_s9 = scalar_lea.hbm %s1228_s0, 256 }
  0x28   :  { %p832_p2 = scmp.ne.s32.totalorder %s1228_s0, %s831_s9  ;;  %p835_p3 = scmp.lt.u32.totalorder %s831_s9, %s1228_s0 }
  0x2a   :  { %p837_p4 = pnand %p835_p3, %p832_p2 }
  0x2c   :  { %840 = shalt.err (!%p837_p4)
}
  0x2d   :  { %s841_s17 = scalar_lea.vmem %s24_s18, 256  ;;  %p846_p6 = scmp.lt.s32.totalorder %s24_s18, %s24_s18 }
  0x2e   :  { %p842_p5 = scmp.ne.s32.totalorder %s24_s18, %s841_s17  ;;  %p847_p7 = scmp.lt.s32.totalorder %s841_s17, %s841_s17 }
  0x30   :  { %p848_p8 = por %p847_p7, %p846_p6 }
  0x32   :  { %p849_p9 = pnand %p848_p8, %p842_p5 }
  0x34   :  { %852 = shalt.err (!%p849_p9)
}
  0x35   :  { %29 = dma.hbm_to_vmem [thread:$0]  %s1228_s0, 256, %s24_s18, [#allocation3], %s952_s11, %s952_s11, %s953_s12  }
  0x36   :  { %s958_s19 = smov [#allocation7]   ;;  %s959_s21 = smov [#allocation10]  }
  0x37   :  { %s47_s20 = sshll.u32 %s958_s19, 4  ;;  %s71_s22 = sshll.u32 %s959_s21, 4  ;;  %s48_s20 = int_to_ptr.vmem [resolvable:$true] %s47_s20  ;;  %s72_s22 = int_to_ptr.vmem [resolvable:$true] %s71_s22 }
  0x38   :  { %s853_s26 = scalar_lea.hbm %s1230_s2, 1024 }
  0x39   :  { %p854_p10 = scmp.ne.s32.totalorder %s1230_s2, %s853_s26  ;;  %p857_p11 = scmp.lt.u32.totalorder %s853_s26, %s1230_s2 }
  0x3b   :  { %p859_p12 = pnand %p857_p11, %p854_p10 }
  0x3d   :  { %862 = shalt.err (!%p859_p12)
}
  0x3e   :  { %s863_s0 = scalar_lea.vmem %s48_s20, 1024  ;;  %p868_p0 = scmp.lt.s32.totalorder %s48_s20, %s48_s20 }
  0x3f   :  { %p864_p13 = scmp.ne.s32.totalorder %s48_s20, %s863_s0  ;;  %p869_p1 = scmp.lt.s32.totalorder %s863_s0, %s863_s0 }
  0x41   :  { %p870_p2 = por %p869_p1, %p868_p0 }
  0x43   :  { %p871_p3 = pnand %p870_p2, %p864_p13 }
  0x45   :  { %874 = shalt.err (!%p871_p3)
}
  0x46   :  { %53 = dma.hbm_to_vmem [thread:$0]  %s1230_s2, 1024, %s48_s20, [#allocation6], %s956_s25, %s956_s25, %s957_s27  }
  0x47   :  { %s875_s13 = scalar_lea.hbm %s1232_s4, 2048 }
  0x48   :  { %p876_p4 = scmp.ne.s32.totalorder %s1232_s4, %s875_s13  ;;  %p879_p5 = scmp.lt.u32.totalorder %s875_s13, %s1232_s4 }
  0x4a   :  { %p881_p6 = pnand %p879_p5, %p876_p4 }
  0x4c   :  { %884 = shalt.err (!%p881_p6)
}
  0x4d   :  { %s885_s16 = scalar_lea.vmem %s72_s22, 2048  ;;  %p890_p8 = scmp.lt.s32.totalorder %s72_s22, %s72_s22 }
  0x4e   :  { %p886_p7 = scmp.ne.s32.totalorder %s72_s22, %s885_s16  ;;  %p891_p9 = scmp.lt.s32.totalorder %s885_s16, %s885_s16 }
  0x50   :  { %p892_p10 = por %p891_p9, %p890_p8 }
  0x52   :  { %p893_p11 = pnand %p892_p10, %p886_p7 }
  0x54   :  { %896 = shalt.err (!%p893_p11)
}
  0x55   :  { %77 = dma.hbm_to_vmem [thread:$0]  %s1232_s4, 2048, %s72_s22, [#allocation9], %s952_s11, %s952_s11, %s953_s12  }
  0x56   :  { %941 = dma.done.wait [#allocation3], 256  }
  0x57   :  { %942 = vsyncadd [#allocation3], 4294967040 }
  0x58   :  { %943 = dma.done.wait [#allocation6], 1280  }
  0x59   :  { %944 = vsyncadd [#allocation6], 4294966016 }
  0x5a   :  { %945 = dma.done.wait [#allocation9], 3072  }
  0x5b   :  { %946 = vsyncadd [#allocation9], 4294964224  ;;  %v960_v0 = vmov 0.0   ;;  %vm961_vm0 = vmmov 0   ;;  %v763_v1 = vld [vmem:[#allocation10] ss:$8 sps:$4 sm:$0xff]  }
  0x5c   :  { %684 = vmatprep.subr.bf16.mxu0 %v960_v0  ;;  %700 = vmatprep.mubr.msk.bf16.mxu0 %vm961_vm0, %v960_v0  ;;  %v764_v2 = vld [vmem:[#allocation10 + $0x10] ss:$8 sps:$4 sm:$0xff]   ;;  %v765_v3 = vld [vmem:[#allocation10 + $0x20] ss:$8 sps:$4 sm:$0xff]   ;;  %v1100_v16 = vld [vmem:[#allocation7 + $0x4] sm:$0xf] }
  0x5d   :  { %704 = vmatprep.subr.bf16.mxu1 %v960_v0  ;;  %720 = vmatprep.mubr.msk.bf16.mxu1 %vm961_vm0, %v960_v0  ;;  %v96_v4 = vld [vmem:[#allocation2] sm:$0xff]  ;;  %v97_v5 = vld [vmem:[#allocation2 + $0x8] sm:$0xff]  ;;  %v98_v6 = vld [vmem:[#allocation5] sm:$0xff]  ;;  %vm344_vm1 = vcmask 7168   ;;  %vm347_vm2 = vcmask 15360   ;;  %vm350_vm3 = vcmask 23552  }
  0x5e   :  { %685 = vmatpush3.bf16.msra.mxu0 %v763_v1  ;;  %v766_v7 = vld [vmem:[#allocation10 + $0x30] ss:$8 sps:$4 sm:$0xff]   ;;  %v100_v9 = vadd.f32 %v98_v6, %v96_v4  ;;  %v767_v11 = vld [vmem:[#allocation10 + $0x40] ss:$8 sps:$4 sm:$0xff]   ;;  %v248_v17 = vld [vmem:[#allocation8 + $0x4] sm:$0xf] }
  0x5f   :  { %686 = vmatprep.subr.bf16.mxu0 %v960_v0  ;;  %v99_v8 = vld [vmem:[#allocation5 + $0x8] sm:$0xff]  ;;  %v769_v13 = vld [vmem:[#allocation10 + $0x60] ss:$8 sps:$4 sm:$0xff]   ;;  %v250_v20 = vadd.bf16 %v248_v17, %v1100_v16  ;;  %v1108_v24 = vld [vmem:[#allocation7 + $0x24] sm:$0xf]  ;;  %vm353_vm4 = vcmask 31744  }
  0x60   :  { %v101_v10 = vadd.f32 %v99_v8, %v97_v5  ;;  %102 = vst [vmem:[#allocation11] sm:$0xff] %v100_v9  ;;  %v768_v12 = vld [vmem:[#allocation10 + $0x50] ss:$8 sps:$4 sm:$0xff]   ;;  %v1102_v18 = vld [vmem:[#allocation7] sm:$0xf]  ;;  %vm356_vm5 = vcmask 39936  }
  0x61   :  { %v770_v14 = vld [vmem:[#allocation10 + $0x70] ss:$8 sps:$4 sm:$0xff]   ;;  %v234_v19 = vld [vmem:[#allocation8] sm:$0xf]  ;;  %v1106_v22 = vld [vmem:[#allocation7 + $0x8] sm:$0xf]  ;;  %v252_v29 = vunpack.c.l.bf16 %v250_v20 }
  0x62   :  { %687 = vmatpush3.bf16.msra.mxu0 %v764_v2  ;;  %103 = vst [vmem:[#allocation11 + $0x8] sm:$0xff] %v101_v10  ;;  %v138_v15 = vpack.c.bf16 %v101_v10, %v100_v9  ;;  %v236_v21 = vadd.bf16 %v234_v19, %v1102_v18  ;;  %v262_v23 = vld [vmem:[#allocation8 + $0x8] sm:$0xf]  ;;  %v249_v25 = vld [vmem:[#allocation8 + $0x24] sm:$0xf]  ;;  %vm359_vm6 = vcmask 48128  }
  0x63   :  { %688 = vmatprep.subr.bf16.mxu0 %v960_v0  ;;  %v639_v26 = vld [vmem:[%s1233_s5] ss:$0 sm:$0xff]  ;;  %v264_v27 = vadd.bf16 %v262_v23, %v1106_v22  ;;  %v1114_v28 = vld [vmem:[#allocation7 + $0xc] sm:$0xf]  ;;  %v251_v31 = vadd.bf16 %v249_v25, %v1108_v24  ;;  %v1117_v33 = vld [vmem:[#allocation7 + $0x28] sm:$0xf] }
  0x64   :  { %v238_v30 = vunpack.c.l.bf16 %v236_v21  ;;  %v276_v32 = vld [vmem:[#allocation8 + $0xc] sm:$0xf]  ;;  %v263_v34 = vld [vmem:[#allocation8 + $0x28] sm:$0xf]  ;;  %v1127_v47 = vld [vmem:[#allocation7 + $0x10] sm:$0xf] }
  0x65   :  { %v266_v39 = vunpack.c.l.bf16 %v264_v27  ;;  %v278_v40 = vadd.bf16 %v276_v32, %v1114_v28  ;;  %v265_v41 = vadd.bf16 %v263_v34, %v1117_v33  ;;  %v253_v46 = vunpack.c.l.bf16 %v251_v31  ;;  %v290_v48 = vld [vmem:[#allocation8 + $0x10] sm:$0xf]  ;;  %v1129_v49 = vld [vmem:[#allocation7 + $0x2c] sm:$0xf]  ;;  %v1135_v57 = vld [vmem:[#allocation7 + $0x14] sm:$0xf] }
  0x66   :  { %689 = vmatpush3.bf16.msra.mxu0 %v765_v3  ;;  %v277_v50 = vld [vmem:[#allocation8 + $0x2c] sm:$0xf]  ;;  %v292_v52 = vadd.bf16 %v290_v48, %v1127_v47  ;;  %v304_v58 = vld [vmem:[#allocation8 + $0x14] sm:$0xf]  ;;  %v1137_v59 = vld [vmem:[#allocation7 + $0x30] sm:$0xf] }
  0x67   :  { %690 = vmatprep.subr.bf16.mxu0 %v960_v0  ;;  %v280_v51 = vunpack.c.l.bf16 %v278_v40  ;;  %v267_v55 = vunpack.c.l.bf16 %v265_v41  ;;  %v279_v56 = vadd.bf16 %v277_v50, %v1129_v49  ;;  %v291_v60 = vld [vmem:[#allocation8 + $0x30] sm:$0xf]  ;;  %v306_v62 = vadd.bf16 %v304_v58, %v1135_v57  ;;  %v1143_v4 = vld [vmem:[#allocation7 + $0x34] sm:$0xf]  ;;  %v1145_v6 = vld [vmem:[#allocation7 + $0x20] sm:$0xf] }
  0x68   :  { %v294_v61 = vunpack.c.l.bf16 %v292_v52  ;;  %v293_v3 = vadd.bf16 %v291_v60, %v1137_v59  ;;  %v305_v5 = vld [vmem:[#allocation8 + $0x34] sm:$0xf]  ;;  %v1153_v17 = vld [vmem:[#allocation7 + $0x18] sm:$0xf]  ;;  %v1161_v31 = vld [vmem:[#allocation7 + $0x1c] sm:$0xf] }
  0x69   :  { %v281_v2 = vunpack.c.l.bf16 %v279_v56  ;;  %v308_v8 = vunpack.c.l.bf16 %v306_v62  ;;  %v307_v9 = vadd.bf16 %v305_v5, %v1143_v4  ;;  %v318_v19 = vld [vmem:[#allocation8 + $0x18] sm:$0xf]  ;;  %v332_v32 = vld [vmem:[#allocation8 + $0x1c] sm:$0xf]  ;;  %vm362_vm7 = vcmask 56320   ;;  %s970_s19 = smov [#allocation11]  }
  0x6a   :  { %691 = vmatpush3.bf16.msra.mxu0 %v766_v7  ;;  %v235_v7 = vld [vmem:[#allocation8 + $0x20] sm:$0xf]  ;;  %v320_v27 = vadd.bf16 %v318_v19, %v1153_v17  ;;  %v334_v40 = vadd.bf16 %v332_v32, %v1161_v31  ;;  %vm365_vm8 = vcmask 64512   ;;  %s609_s20 = sshll.u32 %s970_s19, 4  ;;  %s610_s20 = int_to_ptr.vmem [resolvable:$true] %s609_s20 }
  0x6b   :  { %692 = vmatprep.subr.bf16.mxu0 %v960_v0  ;;  %v309_v20 = vunpack.c.l.bf16 %v307_v9  ;;  %s897_s21 = scalar_lea.vmem %s610_s20, 256  ;;  %p902_p13 = scmp.lt.s32.totalorder %s610_s20, %s610_s20 }
  0x6c   :  { %p898_p12 = scmp.ne.s32.totalorder %s610_s20, %s897_s21  ;;  %p903_p0 = scmp.lt.s32.totalorder %s897_s21, %s897_s21 }
  0x6e   :  { %693 = vmatpush3.bf16.msra.mxu0 %v767_v11  ;;  %p904_p1 = por %p903_p0, %p902_p13 }
  0x6f   :  { %694 = vmatprep.subr.bf16.mxu0 %v960_v0 }
  0x70   :  { %p905_p2 = pnand %p904_p1, %p898_p12 }
  0x72   :  { %695 = vmatpush3.bf16.msra.mxu0 %v768_v12  ;;  %v295_v12 = vunpack.c.l.bf16 %v293_v3 }
  0x73   :  { %696 = vmatprep.subr.bf16.mxu0 %v960_v0 }
  0x76   :  { %697 = vmatpush3.bf16.msra.mxu0 %v769_v13  ;;  %v237_v13 = vadd.bf16 %v235_v7, %v1145_v6 }
  0x77   :  { %698 = vmatprep.subr.bf16.mxu0 %v960_v0 }
  0x7a   :  { %699 = vmatpush3.bf16.msra.mxu0 %v770_v14  ;;  %v1151_v14 = vld [vmem:[#allocation7 + $0x38] sm:$0xf] }
  0x7d   :  { %701 = vmatmul.mubr.bf16.vlgmr.msra.gmra.mrb[0].mxu0 %v138_v15  ;;  %v319_v15 = vld [vmem:[#allocation8 + $0x38] sm:$0xf] }
  0x7e   :  { %v321_v21 = vadd.bf16 %v319_v15, %v1151_v14 }
  0x80   :  { %v323_v34 = vunpack.c.l.bf16 %v321_v21 }
 0x150   :  { %v225_v35 = vpop.f32.mrb[0].mxu0 }
 0x151   :  { %v1119_v36 = vadd.f32 %v639_v26, %v225_v35  ;;  %v702_v37 = vpop.f32.mrb[1].mxu0 }
 0x152   :  { %v228_v38 = vpop.f32.mrb[2].mxu0 }
 0x153   :  { %v1123_v42 = vadd.f32 %v639_v26, %v228_v38  ;;  %v703_v43 = vpop.f32.mrb[3].mxu0  ;;  %v254_v44 = vmul.f32 %v252_v29, %v1119_v36  ;;  %v240_v45 = vmul.f32 %v238_v30, %v1119_v36  ;;  %v268_v53 = vmul.f32 %v266_v39, %v1119_v36  ;;  %v1159_v29 = vld [vmem:[#allocation7 + $0x3c] sm:$0xf] }
 0x154   :  { %v282_v63 = vmul.f32 %v280_v51, %v1119_v36  ;;  %v296_v10 = vmul.f32 %v294_v61, %v1119_v36  ;;  %v310_v23 = vmul.f32 %v308_v8, %v1119_v36  ;;  %v239_v26 = vunpack.c.l.bf16 %v237_v13  ;;  %v333_v30 = vld [vmem:[#allocation8 + $0x3c] sm:$0xf] }
 0x155   :  { %256 = vadd.xlane.f32.xlu1 %v254_v44  ;;  %242 = vadd.xlane.f32.xlu0 %v240_v45  ;;  %v255_v54 = vmul.f32 %v253_v46, %v1123_v42  ;;  %v269_v1 = vmul.f32 %v267_v55, %v1123_v42  ;;  %v283_v11 = vmul.f32 %v281_v2, %v1123_v42  ;;  %v322_v39 = vunpack.c.l.bf16 %v320_v27 }
 0x156   :  { %v297_v25 = vmul.f32 %v295_v12, %v1123_v42  ;;  %v335_v35 = vadd.bf16 %v333_v30, %v1159_v29  ;;  %v311_v37 = vmul.f32 %v309_v20, %v1123_v42  ;;  %v241_v38 = vmul.f32 %v239_v26, %v1123_v42 }
 0x157   :  { %v325_v41 = vmul.f32 %v323_v34, %v1123_v42  ;;  %v324_v43 = vmul.f32 %v322_v39, %v1119_v36  ;;  %v336_v45 = vunpack.c.l.bf16 %v334_v40 }
 0x158   :  { %v337_v44 = vunpack.c.l.bf16 %v335_v35 }
 0x159   :  { %270 = vadd.xlane.f32.xlu0 %v268_v53  ;;  %258 = vadd.xlane.f32.xlu1 %v255_v54  ;;  %v338_v48 = vmul.f32 %v336_v45, %v1119_v36 }
 0x15a   :  { %v339_v46 = vmul.f32 %v337_v44, %v1123_v42  ;;  %v963_v44 = vmov 0  }
 0x15b   :  { %747 = vset.pattern.permute.xlu0 %v963_v44 }
 0x15d   :  { %284 = vadd.xlane.f32.xlu0 %v282_v63  ;;  %272 = vadd.xlane.f32.xlu1 %v269_v1 }
 0x161   :  { %298 = vadd.xlane.f32.xlu0 %v296_v10  ;;  %286 = vadd.xlane.f32.xlu1 %v283_v11 }
 0x165   :  { %312 = vadd.xlane.f32.xlu0 %v310_v23  ;;  %300 = vadd.xlane.f32.xlu1 %v297_v25 }
 0x169   :  { %314 = vadd.xlane.f32.xlu1 %v311_v37  ;;  %244 = vadd.xlane.f32.xlu0 %v241_v38 }
 0x16d   :  { %328 = vadd.xlane.f32.xlu1 %v325_v41  ;;  %326 = vadd.xlane.f32.xlu0 %v324_v43  ;;  %v962_v43 = vmov 1  }
 0x16e   :  { %748 = vset.pattern.permute.xlu1 %v962_v43 }
 0x171   :  { %342 = vadd.xlane.f32.xlu1 %v339_v46  ;;  %340 = vadd.xlane.f32.xlu0 %v338_v48 }
 0x1e2   :  { %v257_v50 = vpop.xlane.xlu1 %256  ;;  %v243_v51 = vpop.xlane.xlu0 %242 }
 0x1e3   :  { %v345_v36 = vsel %vm344_vm1, %v243_v51, %v257_v50  ;;  %v964_v51 = vmov 2  }
 0x1e6   :  { %v271_v52 = vpop.xlane.xlu0 %270  ;;  %v259_v53 = vpop.xlane.xlu1 %258 }
 0x1e7   :  { %v348_v3 = vsel %vm347_vm2, %v345_v36, %v271_v52  ;;  %v965_v52 = vmov 6   ;;  %v776_v36 = vld [vmem:[#allocation10 + $0x54] ss:$8 sps:$4 sm:$0xff]  }
 0x1ea   :  { %v285_v54 = vpop.xlane.xlu0 %284  ;;  %v273_v55 = vpop.xlane.xlu1 %272 }
 0x1eb   :  { %v351_v9 = vsel %vm350_vm3, %v348_v3, %v285_v54  ;;  %v778_v3 = vld [vmem:[#allocation10 + $0x74] ss:$8 sps:$4 sm:$0xff]  }
 0x1ee   :  { %v299_v56 = vpop.xlane.xlu0 %298  ;;  %v287_v58 = vpop.xlane.xlu1 %286 }
 0x1ef   :  { %v354_v11 = vsel %vm353_vm4, %v351_v9, %v299_v56  ;;  %v967_v56 = vmov 4  }
 0x1f2   :  { %v313_v60 = vpop.xlane.xlu0 %312  ;;  %v301_v61 = vpop.xlane.xlu1 %300 }
 0x1f3   :  { %v357_v12 = vsel %vm356_vm5, %v354_v11, %v313_v60  ;;  %v969_v60 = vmov 5  }
 0x1f6   :  { %v315_v62 = vpop.xlane.xlu1 %314  ;;  %v245_v63 = vpop.xlane.xlu0 %244 }
 0x1f7   :  { %v346_v1 = vsel %vm344_vm1, %v245_v63, %v259_v53  ;;  %v773_v63 = vld [vmem:[#allocation10 + $0x24] ss:$8 sps:$4 sm:$0xff]  }
 0x1f8   :  { %v349_v42 = vsel %vm347_vm2, %v346_v1, %v273_v55  ;;  %v966_v55 = vmov 3   ;;  %v774_v1 = vld [vmem:[#allocation10 + $0x34] ss:$8 sps:$4 sm:$0xff]  }
 0x1f9   :  { %v352_v2 = vsel %vm350_vm3, %v349_v42, %v287_v58  ;;  %v968_v58 = vmov 7   ;;  %v775_v42 = vld [vmem:[#allocation10 + $0x44] ss:$8 sps:$4 sm:$0xff]  }
 0x1fa   :  { %v329_v5 = vpop.xlane.xlu1 %328  ;;  %v355_v7 = vsel %vm353_vm4, %v352_v2, %v301_v61  ;;  %v327_v8 = vpop.xlane.xlu0 %326  ;;  %v771_v61 = vld [vmem:[#allocation10 + $0x4] ss:$8 sps:$4 sm:$0xff]  }
 0x1fb   :  { %v358_v10 = vsel %vm356_vm5, %v355_v7, %v315_v62  ;;  %v360_v15 = vsel %vm359_vm6, %v357_v12, %v327_v8  ;;  %705 = vmatpush3.bf16.msra.mxu1 %v771_v61  ;;  %v772_v62 = vld [vmem:[#allocation10 + $0x14] ss:$8 sps:$4 sm:$0xff]   ;;  %v777_v2 = vld [vmem:[#allocation10 + $0x64] ss:$8 sps:$4 sm:$0xff]  }
 0x1fc   :  { %v361_v13 = vsel %vm359_vm6, %v358_v10, %v329_v5  ;;  %706 = vmatprep.subr.bf16.mxu1 %v960_v0 }
 0x1fe   :  { %v343_v19 = vpop.xlane.xlu1 %342  ;;  %v341_v20 = vpop.xlane.xlu0 %340 }
 0x1ff   :  { %v364_v21 = vsel %vm362_vm7, %v361_v13, %v343_v19  ;;  %v363_v23 = vsel %vm362_vm7, %v360_v15, %v341_v20  ;;  %707 = vmatpush3.bf16.msra.mxu1 %v772_v62  ;;  %v403_v15 = vunpack.c.l.bf16 %v1108_v24  ;;  %v389_v19 = vunpack.c.l.bf16 %v1145_v6 }
 0x200   :  { %v369_v25 = vsel %vm365_vm8, %v364_v21, -inf  ;;  %v366_v26 = vsel %vm365_vm8, %v363_v23, -inf  ;;  %708 = vmatprep.subr.bf16.mxu1 %v960_v0  ;;  %v417_v20 = vunpack.c.l.bf16 %v1117_v33  ;;  %v430_v24 = vunpack.c.l.bf16 %v1114_v28 }
 0x201   :  { %370 = vmax.xlane.f32.xlu1 %v369_v25  ;;  %367 = vmax.xlane.f32.xlu0 %v366_v26 }
 0x203   :  { %709 = vmatpush3.bf16.msra.mxu1 %v773_v63 }
 0x204   :  { %710 = vmatprep.subr.bf16.mxu1 %v960_v0 }
 0x207   :  { %711 = vmatpush3.bf16.msra.mxu1 %v774_v1 }
 0x208   :  { %712 = vmatprep.subr.bf16.mxu1 %v960_v0 }
 0x20b   :  { %713 = vmatpush3.bf16.msra.mxu1 %v775_v42 }
 0x20c   :  { %714 = vmatprep.subr.bf16.mxu1 %v960_v0 }
 0x20f   :  { %715 = vmatpush3.bf16.msra.mxu1 %v776_v36 }
 0x210   :  { %716 = vmatprep.subr.bf16.mxu1 %v960_v0 }
 0x213   :  { %717 = vmatpush3.bf16.msra.mxu1 %v777_v2 }
 0x214   :  { %718 = vmatprep.subr.bf16.mxu1 %v960_v0  ;;  %v388_v0 = vunpack.c.l.bf16 %v1102_v18  ;;  %v444_v18 = vunpack.c.l.bf16 %v1127_v47  ;;  %v472_v47 = vunpack.c.l.bf16 %v1153_v17 }
 0x217   :  { %719 = vmatpush3.bf16.msra.mxu1 %v778_v3 }
 0x28e   :  { %v371_v27 = vpop.xlane.xlu1 %370  ;;  %v368_v30 = vpop.xlane.xlu0 %367 }
 0x28f   :  { %v373_v32 = vsub.f32 %v364_v21, %v371_v27  ;;  %v372_v34 = vsub.f32 %v363_v23, %v368_v30  ;;  %v402_v23 = vunpack.c.l.bf16 %v1100_v16  ;;  %v431_v27 = vunpack.c.l.bf16 %v1129_v49 }
 0x290   :  { %v416_v30 = vunpack.c.l.bf16 %v1106_v22  ;;  %v445_v16 = vunpack.c.l.bf16 %v1137_v59  ;;  %v458_v49 = vunpack.c.l.bf16 %v1135_v57 }
 0x291   :  { %v376_v35 = vmul.f32 1.442695, %v373_v32  ;;  %v374_v37 = vmul.f32 1.442695, %v372_v34 }
 0x293   :  { %779 = vpow2.f32 %v376_v35 }
 0x294   :  { %781 = vpow2.f32 %v374_v37 }
 0x29d   :  { %v780_v38 = vpop.eup %779 }
 0x29e   :  { %v782_v39 = vpop.eup %781  ;;  %v381_v40 = vsel %vm365_vm8, %v780_v38, 0.0 }
 0x29f   :  { %382 = vadd.xlane.f32.xlu1 %v381_v40  ;;  %v378_v41 = vsel %vm365_vm8, %v782_v39, 0.0 }
 0x2a0   :  { %379 = vadd.xlane.f32.xlu0 %v378_v41 }
 0x32c   :  { %v383_v46 = vpop.xlane.xlu1 %382 }
 0x32d   :  { %v380_v45 = vpop.xlane.xlu0 %379 }
 0x32e   :  { %783 = vrcp.f32 %v380_v45  ;;  %v459_v45 = vunpack.c.l.bf16 %v1143_v4  ;;  %v486_v4 = vunpack.c.l.bf16 %v1161_v31 }
 0x32f   :  { %785 = vrcp.f32 %v383_v46 }
 0x338   :  { %v784_v48 = vpop.eup %783 }
 0x339   :  { %v386_v50 = vmul.f32 %v784_v48, %v782_v39  ;;  %v786_v53 = vpop.eup %785 }
 0x33a   :  { %v387_v54 = vmul.f32 %v786_v53, %v780_v38 }
 0x33b   :  { %405 = vperm.xlu1 %748, %v386_v50   ;;  %392 = vperm.xlu0 %747, %v386_v50  }
 0x33f   :  { %749 = vset.pattern.permute.xlu1 %v964_v51  ;;  %753 = vset.pattern.permute.xlu0 %v965_v52 }
 0x340   :  { %419 = vperm.xlu1 %749, %v386_v50   ;;  %475 = vperm.xlu0 %753, %v386_v50  }
 0x344   :  { %750 = vset.pattern.permute.xlu1 %v966_v55  ;;  %758 = vset.pattern.permute.xlu0 %v967_v56 }
 0x345   :  { %433 = vperm.xlu1 %750, %v386_v50   ;;  %451 = vperm.xlu0 %758, %v387_v54  }
 0x349   :  { %751 = vset.pattern.permute.xlu1 %v967_v56  ;;  %762 = vset.pattern.permute.xlu0 %v968_v58 }
 0x34a   :  { %447 = vperm.xlu1 %751, %v386_v50   ;;  %493 = vperm.xlu0 %762, %v387_v54  }
 0x34e   :  { %752 = vset.pattern.permute.xlu1 %v969_v60 }
 0x34f   :  { %461 = vperm.xlu1 %752, %v386_v50  }
 0x353   :  { %754 = vset.pattern.permute.xlu1 %v963_v44 }
 0x354   :  { %397 = vperm.xlu1 %754, %v387_v54  }
 0x358   :  { %755 = vset.pattern.permute.xlu1 %v962_v43 }
 0x359   :  { %409 = vperm.xlu1 %755, %v387_v54  }
 0x35d   :  { %756 = vset.pattern.permute.xlu1 %v964_v51  ;;  %v473_v51 = vunpack.c.l.bf16 %v1151_v14 }
 0x35e   :  { %423 = vperm.xlu1 %756, %v387_v54  }
 0x362   :  { %757 = vset.pattern.permute.xlu1 %v966_v55 }
 0x363   :  { %437 = vperm.xlu1 %757, %v387_v54  }
 0x367   :  { %759 = vset.pattern.permute.xlu1 %v969_v60 }
 0x368   :  { %465 = vperm.xlu1 %759, %v387_v54  }
 0x36c   :  { %760 = vset.pattern.permute.xlu1 %v965_v52 }
 0x36d   :  { %479 = vperm.xlu1 %760, %v387_v54  }
 0x371   :  { %761 = vset.pattern.permute.xlu1 %v968_v58  ;;  %v487_v58 = vunpack.c.l.bf16 %v1159_v29 }
 0x372   :  { %489 = vperm.xlu1 %761, %v386_v50  }
 0x3ba   :  { %v406_v5 = vpop.permute.xlu1 %405  ;;  %v393_v13 = vpop.permute.xlu0 %392 }
 0x3bb   :  { %v412_v35 = vmul.f32 %v406_v5, %v402_v23  ;;  %v400_v37 = vmul.f32 %v393_v13, %v388_v0 }
 0x3bd   :  { %v414_v43 = vadd.f32 %v412_v35, %v400_v37 }
 0x3bf   :  { %v420_v7 = vpop.permute.xlu1 %419  ;;  %v476_v26 = vpop.permute.xlu0 %475 }
 0x3c0   :  { %v426_v39 = vmul.f32 %v420_v7, %v416_v30  ;;  %v482_v63 = vmul.f32 %v476_v26, %v472_v47 }
 0x3c2   :  { %v428_v48 = vadd.f32 %v426_v39, %v414_v43 }
 0x3c4   :  { %v434_v8 = vpop.permute.xlu1 %433  ;;  %v452_v41 = vpop.permute.xlu0 %451 }
 0x3c5   :  { %v440_v22 = vmul.f32 %v434_v8, %v430_v24  ;;  %v455_v28 = vmul.f32 %v452_v41, %v445_v16 }
 0x3c7   :  { %v442_v52 = vadd.f32 %v440_v22, %v428_v48 }
 0x3c9   :  { %v448_v9 = vpop.permute.xlu1 %447  ;;  %v494_v62 = vpop.permute.xlu0 %493 }
 0x3ca   :  { %v454_v50 = vmul.f32 %v448_v9, %v444_v18  ;;  %v497_v14 = vmul.f32 %v494_v62, %v487_v58 }
 0x3cc   :  { %v456_v55 = vadd.f32 %v454_v50, %v442_v52 }
 0x3ce   :  { %v462_v10 = vpop.permute.xlu1 %461 }
 0x3cf   :  { %v468_v53 = vmul.f32 %v462_v10, %v458_v49 }
 0x3d1   :  { %v470_v60 = vadd.f32 %v468_v53, %v456_v55 }
 0x3d3   :  { %v398_v11 = vpop.permute.xlu1 %397  ;;  %v484_v36 = vadd.f32 %v482_v63, %v470_v60 }
 0x3d4   :  { %v401_v32 = vmul.f32 %v398_v11, %v389_v19 }
 0x3d8   :  { %v410_v12 = vpop.permute.xlu1 %409 }
 0x3d9   :  { %v413_v25 = vmul.f32 %v410_v12, %v403_v15 }
 0x3db   :  { %v415_v6 = vadd.f32 %v413_v25, %v401_v32 }
 0x3dd   :  { %v424_v21 = vpop.permute.xlu1 %423 }
 0x3de   :  { %v427_v34 = vmul.f32 %v424_v21, %v417_v20 }
 0x3e0   :  { %v429_v40 = vadd.f32 %v427_v34, %v415_v6 }
 0x3e2   :  { %v438_v38 = vpop.permute.xlu1 %437 }
 0x3e3   :  { %v441_v33 = vmul.f32 %v438_v38, %v431_v27 }
 0x3e5   :  { %v443_v44 = vadd.f32 %v441_v33, %v429_v40 }
 0x3e7   :  { %v466_v46 = vpop.permute.xlu1 %465  ;;  %v457_v59 = vadd.f32 %v455_v28, %v443_v44 }
 0x3e8   :  { %v469_v54 = vmul.f32 %v466_v46, %v459_v45 }
 0x3ea   :  { %v471_v61 = vadd.f32 %v469_v54, %v457_v59 }
 0x3ec   :  { %v480_v56 = vpop.permute.xlu1 %479 }
 0x3ed   :  { %v483_v57 = vmul.f32 %v480_v56, %v473_v51 }
 0x3ef   :  { %v485_v1 = vadd.f32 %v483_v57, %v471_v61 }
 0x3f1   :  { %v490_v42 = vpop.permute.xlu1 %489  ;;  %v499_v3 = vadd.f32 %v497_v14, %v485_v1 }
 0x3f2   :  { %v496_v2 = vmul.f32 %v490_v42, %v486_v4 }
 0x3f4   :  { %v498_v5 = vadd.f32 %v496_v2, %v484_v36 }
 0x3f6   :  { %v500_v7 = vpack.c.bf16 %v499_v3, %v498_v5 }
 0x3f8   :  { %721 = vmatmul.mubr.bf16.vlgmr.msra.gmra.mrb[0].mxu1 %v500_v7 }
 0x3f9   :  { %908 = shalt.err (!%p905_p2)
}
 0x3fa   :  { %s909_s24 = scalar_lea.hbm %s1234_s6, 256 }
 0x3fb   :  { %p910_p3 = scmp.ne.s32.totalorder %s1234_s6, %s909_s24  ;;  %p913_p4 = scmp.lt.u32.totalorder %s909_s24, %s1234_s6 }
 0x3fd   :  { %p915_p5 = pnand %p913_p4, %p910_p3 }
 0x3ff   :  { %918 = shalt.err (!%p915_p5)
}
 0x400   :  { %615 = dma.vmem_to_hbm [thread:$0]  %s610_s20, 256, %s1234_s6, [#allocation4], %s952_s11, %s952_s11, %s953_s12  }
 0x401   :  { %v648_v17 = vld [vmem:[%s1233_s5 + $0x1] ss:$0 sm:$0xff]  ;;  %s971_s9 = smov [#allocation12]  }
 0x402   :  { %s621_s10 = sshll.u32 %s971_s9, 4  ;;  %s622_s10 = int_to_ptr.vmem [resolvable:$true] %s621_s10 }
 0x403   :  { %s919_s13 = scalar_lea.vmem %s622_s10, 128  ;;  %p924_p7 = scmp.lt.s32.totalorder %s622_s10, %s622_s10 }
 0x404   :  { %p920_p6 = scmp.ne.s32.totalorder %s622_s10, %s919_s13  ;;  %p925_p8 = scmp.lt.s32.totalorder %s919_s13, %s919_s13 }
 0x406   :  { %p926_p9 = por %p925_p8, %p924_p7 }
 0x408   :  { %p927_p10 = pnand %p926_p9, %p920_p6 }
 0x4cb   :  { %v587_v29 = vpop.f32.mrb[0].mxu1 }
 0x4cc   :  { %v722_v31 = vpop.f32.mrb[1].mxu1  ;;  %v588_v9 = vadd.f32 %v648_v17, %v587_v29 }
 0x4cd   :  { %v590_v8 = vpop.f32.mrb[2].mxu1 }
 0x4ce   :  { %v591_v10 = vadd.f32 %v648_v17, %v590_v8  ;;  %v723_v11 = vpop.f32.mrb[3].mxu1 }
 0x4d0   :  { %v664_v12 = vpack.c.bf16 %v591_v10, %v588_v9 }
 0x4d2   :  { %665 = vst [vmem:[#allocation12] sm:$0xff] %v664_v12  }
 0x4d3   :  { %930 = shalt.err (!%p927_p10)
}
 0x4d4   :  { %s931_s11 = scalar_lea.hbm %s1235_s7, 128 }
 0x4d5   :  { %p932_p11 = scmp.ne.s32.totalorder %s1235_s7, %s931_s11  ;;  %p935_p12 = scmp.lt.u32.totalorder %s931_s11, %s1235_s7 }
 0x4d7   :  { %p937_p13 = pnand %p935_p12, %p932_p11 }
 0x4d9   :  { %940 = shalt.err (!%p937_p13)
}
 0x4da   :  { %s972_s3 = smov 64   ;;  %s973_s16 = smov 4  }
 0x4db   :  { %627 = dma.vmem_to_hbm [thread:$0]  %s622_s10, 128, %s1235_s7, [#allocation13], %s972_s3, %s972_s3, %s973_s16  }
 0x4dc   :  { %947 = dma.done.wait [#allocation4], 256  }
 0x4dd   :  { %948 = vsyncadd [#allocation4], 4294967040 }
 0x4de   :  { %949 = dma.done.wait [#allocation13], 128  }
 0x4df   :  { %950 = vsyncadd [#allocation13], 4294967168 }
 0x4e0   :  { %634 = vsyncpa [#allocation3], 1 }
 0x4e1   :  { %635 = vsyncpa [#allocation6], 1 }
 0x4e2   :  { %636 = vsyncpa [#allocation9], 1 }
 0x4e3   :  { %637 = vsyncpa [#allocation4], 1 }
 0x4e4   :  { %638 = vsyncpa [#allocation13], 1 }

</bundles_post_ra>
